<compile_context>
chip_gen: v7x
topology: tpu7x:2x2x1
jax: 0.10.0
libtpu: 0.0.40
codegen_flags: <defaults>
</compile_context>

<pallas_src>
import jax
import jax.numpy as jnp
from jax.experimental import pallas as pl
from jax.experimental.pallas import tpu as pltpu

INPUT_DIM = 5
HIDDEN = 32
LAYERS = 10
OUTPUT = 5
PACK = 4  # batch rows packed into the lane dimension


def _saivr_kernel(x_ref, w_in_ref, b_in_ref, w_h_ref, b_h_ref,
                  w_out_ref, b_out_ref, out_ref):
    # first linear: (TILE_M, PACK*in) @ (PACK*in, PACK*hidden) + bias
    h = jnp.dot(x_ref[...], w_in_ref[...],
                preferred_element_type=jnp.float32) + b_in_ref[...]

    # `layers` copies of the SAME (Linear + Sigmoid) block (shared weights).
    # Hoist the weight load and the bias broadcast out of the unrolled loop.
    w_h = w_h_ref[...]
    b_h = jnp.broadcast_to(b_h_ref[...], h.shape)
    for _ in range(LAYERS):  # static unroll, shared weights
        h = jax.nn.sigmoid(
            jnp.dot(h, w_h, preferred_element_type=jnp.float32) + b_h)

    # output linear: (TILE_M, PACK*hidden) @ (PACK*hidden, PACK*out) + bias
    out_ref[...] = (jnp.dot(h, w_out_ref[...],
                            preferred_element_type=jnp.float32)
                    + b_out_ref[...]).astype(out_ref.dtype)


def _round_up(a, b):
    return (a + b - 1) // b * b


def _block_diag(w, pack):
    """Pack `pack` copies of w on the block diagonal (host-side, once)."""
    fi, fo = w.shape
    eye = jnp.eye(pack, dtype=w.dtype)
    return (eye[:, None, :, None] * w[None, :, None, :]).reshape(pack * fi,
                                                                 pack * fo)


def pack_params(params, pack=PACK):
    """Build lane-packed (block-diagonal) weights from raw Linear params."""
    w_in, b_in, w_h, b_h, w_out, b_out = params
    return (_block_diag(w_in, pack), jnp.tile(b_in, (1, pack)),
            _block_diag(w_h, pack), jnp.tile(b_h, (1, pack)),
            _block_diag(w_out, pack), jnp.tile(b_out, (1, pack)))


def saivr_forward(x, packed_params, *, tile_m=512):
    """Returns (s_N, a_N, i_N, v_N, r_N), each of shape (N, 1)."""
    w_in, b_in, w_h, b_h, w_out, b_out = packed_params
    n = x.shape[0]

    # Pack PACK rows into the lane dim: (N, 5) -> (M, 20), M = ceil(N/PACK),
    # padded so the batch grid tiles evenly (padding rows are discarded).
    m = pl.cdiv(n, PACK)
    tile = min(tile_m, _round_up(m, 8))
    m_pad = _round_up(m, tile)
    n_pad = m_pad * PACK
    x_p = jnp.pad(x, ((0, n_pad - n), (0, 0))).reshape(m_pad,
                                                       PACK * INPUT_DIM)

    def _full(arr):  # weights/biases: resident, same block every grid step
        return pl.BlockSpec(arr.shape, lambda i: (0, 0))

    flops = n * (2 * INPUT_DIM * HIDDEN
                 + LAYERS * 2 * HIDDEN * HIDDEN
                 + 2 * HIDDEN * OUTPUT)
    transcendentals = n * LAYERS * HIDDEN
    bytes_accessed = (n * (INPUT_DIM + OUTPUT) * 4
                      + sum(int(p.size) * 4 for p in packed_params))

    y_p = pl.pallas_call(
        _saivr_kernel,
        out_shape=jax.ShapeDtypeStruct((m_pad, PACK * OUTPUT), jnp.float32),
        grid=(m_pad // tile,),
        in_specs=[
            pl.BlockSpec((tile, PACK * INPUT_DIM), lambda i: (i, 0)),
            _full(w_in), _full(b_in),
            _full(w_h), _full(b_h),
            _full(w_out), _full(b_out),
        ],
        out_specs=pl.BlockSpec((tile, PACK * OUTPUT), lambda i: (i, 0)),
        compiler_params=pltpu.CompilerParams(
            dimension_semantics=("parallel",)),
        cost_estimate=pl.CostEstimate(flops=int(flops),
                                      transcendentals=int(transcendentals),
                                      bytes_accessed=int(bytes_accessed)),
    )(x_p, w_in, b_in, w_h, b_h, w_out, b_out)

    # Unpack lanes back to rows (free row-major reshape) and drop padding.
    y = y_p.reshape(n_pad, OUTPUT)[:n]
    s_N = y[:, 0].reshape(-1, 1)
    a_N = y[:, 1].reshape(-1, 1)
    i_N = y[:, 2].reshape(-1, 1)
    v_N = y[:, 3].reshape(-1, 1)
    r_N = y[:, 4].reshape(-1, 1)
    return (s_N, a_N, i_N, v_N, r_N)


def init_params(key):
    """Deterministic init matching nn.Linear shapes (uniform ±1/sqrt(fan_in))."""
    ks = jax.random.split(key, 6)

    def lin(kw, kb, fan_in, fan_out):
        bound = 1.0 / jnp.sqrt(jnp.float32(fan_in))
        w = jax.random.uniform(kw, (fan_in, fan_out), jnp.float32, -bound, bound)
        b = jax.random.uniform(kb, (1, fan_out), jnp.float32, -bound, bound)
        return w, b

    w_in, b_in = lin(ks[0], ks[1], INPUT_DIM, HIDDEN)
    w_h, b_h = lin(ks[2], ks[3], HIDDEN, HIDDEN)      # shared across LAYERS blocks
    w_out, b_out = lin(ks[4], ks[5], HIDDEN, OUTPUT)
    return (w_in, b_in, w_h, b_h, w_out, b_out)


def _reference_forward(x, params):
    w_in, b_in, w_h, b_h, w_out, b_out = params
    h = x @ w_in + b_in
    for _ in range(LAYERS):
        h = jax.nn.sigmoid(h @ w_h + b_h)
    y = h @ w_out + b_out
    return tuple(y[:, i].reshape(-1, 1) for i in range(OUTPUT))


if __name__ == "__main__":
    key = jax.random.PRNGKey(0)
    k_x, k_p = jax.random.split(key)
    params = init_params(k_p)
    packed = pack_params(params)

    # Two configurations: tiny batch (single tile) and a multi-tile grid
    # with a batch size that is not a multiple of PACK (exercises padding).
    for batch, tile_m in ((8, 512), (1030, 128)):
        x = jax.random.normal(jax.random.fold_in(k_x, batch),
                              (batch, INPUT_DIM), jnp.float32)
        out = saivr_forward(x, packed, tile_m=tile_m)
        out = jax.block_until_ready(out)

        ref = _reference_forward(x, params)
        for o, r in zip(out, ref):
            assert o.shape == (batch, 1)
            assert jnp.max(jnp.abs(o - r)) < 1e-5

    print("KERNEL_OK")
</pallas_src>

<mosaic_0001>
module attributes {stable_mosaic.version = 11 : i64} {
  func.func @_saivr_kernel(%arg0: i32, %arg1: memref<8x20xf32, #tpu.memory_space<vmem>>, %arg2: memref<20x128xf32, #tpu.memory_space<vmem>>, %arg3: memref<1x128xf32, #tpu.memory_space<vmem>>, %arg4: memref<128x128xf32, #tpu.memory_space<vmem>>, %arg5: memref<1x128xf32, #tpu.memory_space<vmem>>, %arg6: memref<128x20xf32, #tpu.memory_space<vmem>>, %arg7: memref<1x20xf32, #tpu.memory_space<vmem>>, %arg8: memref<8x20xf32, #tpu.memory_space<vmem>>) attributes {dimension_semantics = [#tpu.dimension_semantics<parallel>], iteration_bounds = array<i64: 1>, scalar_prefetch = 0 : i64, scratch_operands = 0 : i64, tpu.core_type = #tpu.core_type<tc>, window_params = [{transform_indices = @transform_0, window_bounds = array<i64: 8, 20>}, {pipeline_mode = #tpu.pipeline_mode<synchronous>, transform_indices = @transform_1, window_bounds = array<i64: 20, 128>}, {pipeline_mode = #tpu.pipeline_mode<synchronous>, transform_indices = @transform_2, window_bounds = array<i64: 1, 128>}, {pipeline_mode = #tpu.pipeline_mode<synchronous>, transform_indices = @transform_3, window_bounds = array<i64: 128, 128>}, {pipeline_mode = #tpu.pipeline_mode<synchronous>, transform_indices = @transform_4, window_bounds = array<i64: 1, 128>}, {pipeline_mode = #tpu.pipeline_mode<synchronous>, transform_indices = @transform_5, window_bounds = array<i64: 128, 20>}, {pipeline_mode = #tpu.pipeline_mode<synchronous>, transform_indices = @transform_6, window_bounds = array<i64: 1, 20>}, {transform_indices = @transform_7, window_bounds = array<i64: 8, 20>}]} {
    %c0 = arith.constant 0 : index
    %c0_0 = arith.constant 0 : index
    %0 = vector.load %arg1[%c0, %c0_0] : memref<8x20xf32, #tpu.memory_space<vmem>>, vector<8x20xf32>
    %c0_1 = arith.constant 0 : index
    %c0_2 = arith.constant 0 : index
    %1 = vector.load %arg2[%c0_1, %c0_2] : memref<20x128xf32, #tpu.memory_space<vmem>>, vector<20x128xf32>
    %cst = arith.constant dense<0.000000e+00> : vector<8x128xf32>
    %2 = tpu.matmul %0, %1, %cst {dimension_numbers = #tpu.dot_dimension_numbers<[1], [0], [0], [1], [0, 0, 1, 1], [], []>} : vector<8x20xf32>, vector<20x128xf32>, vector<8x128xf32> -> vector<8x128xf32>
    %c0_3 = arith.constant 0 : index
    %c0_4 = arith.constant 0 : index
    %3 = vector.load %arg3[%c0_3, %c0_4] : memref<1x128xf32, #tpu.memory_space<vmem>>, vector<1x128xf32>
    %4 = vector.broadcast %3 : vector<1x128xf32> to vector<8x128xf32>
    %5 = arith.addf %2, %4 : vector<8x128xf32>
    %c0_5 = arith.constant 0 : index
    %c0_6 = arith.constant 0 : index
    %6 = vector.load %arg4[%c0_5, %c0_6] : memref<128x128xf32, #tpu.memory_space<vmem>>, vector<128x128xf32>
    %c0_7 = arith.constant 0 : index
    %c0_8 = arith.constant 0 : index
    %7 = vector.load %arg5[%c0_7, %c0_8] : memref<1x128xf32, #tpu.memory_space<vmem>>, vector<1x128xf32>
    %8 = vector.shape_cast %7 : vector<1x128xf32> to vector<1x128xf32>
    %9 = vector.broadcast %8 : vector<1x128xf32> to vector<8x128xf32>
    %cst_9 = arith.constant dense<0.000000e+00> : vector<8x128xf32>
    %10 = tpu.matmul %5, %6, %cst_9 {dimension_numbers = #tpu.dot_dimension_numbers<[1], [0], [0], [1], [0, 0, 1, 1], [], []>} : vector<8x128xf32>, vector<128x128xf32>, vector<8x128xf32> -> vector<8x128xf32>
    %11 = arith.addf %10, %9 : vector<8x128xf32>
    %12 = arith.negf %11 : vector<8x128xf32>
    %13 = math.exp %12 : vector<8x128xf32>
    %cst_10 = arith.constant 1.000000e+00 : f32
    %14 = vector.broadcast %cst_10 : f32 to vector<8x128xf32>
    %15 = arith.addf %14, %13 : vector<8x128xf32>
    %16 = arith.divf %14, %15 : vector<8x128xf32>
    %cst_11 = arith.constant dense<0.000000e+00> : vector<8x128xf32>
    %17 = tpu.matmul %16, %6, %cst_11 {dimension_numbers = #tpu.dot_dimension_numbers<[1], [0], [0], [1], [0, 0, 1, 1], [], []>} : vector<8x128xf32>, vector<128x128xf32>, vector<8x128xf32> -> vector<8x128xf32>
    %18 = arith.addf %17, %9 : vector<8x128xf32>
    %19 = arith.negf %18 : vector<8x128xf32>
    %20 = math.exp %19 : vector<8x128xf32>
    %cst_12 = arith.constant 1.000000e+00 : f32
    %21 = vector.broadcast %cst_12 : f32 to vector<8x128xf32>
    %22 = arith.addf %21, %20 : vector<8x128xf32>
    %23 = arith.divf %21, %22 : vector<8x128xf32>
    %cst_13 = arith.constant dense<0.000000e+00> : vector<8x128xf32>
    %24 = tpu.matmul %23, %6, %cst_13 {dimension_numbers = #tpu.dot_dimension_numbers<[1], [0], [0], [1], [0, 0, 1, 1], [], []>} : vector<8x128xf32>, vector<128x128xf32>, vector<8x128xf32> -> vector<8x128xf32>
    %25 = arith.addf %24, %9 : vector<8x128xf32>
    %26 = arith.negf %25 : vector<8x128xf32>
    %27 = math.exp %26 : vector<8x128xf32>
    %cst_14 = arith.constant 1.000000e+00 : f32
    %28 = vector.broadcast %cst_14 : f32 to vector<8x128xf32>
    %29 = arith.addf %28, %27 : vector<8x128xf32>
    %30 = arith.divf %28, %29 : vector<8x128xf32>
    %cst_15 = arith.constant dense<0.000000e+00> : vector<8x128xf32>
    %31 = tpu.matmul %30, %6, %cst_15 {dimension_numbers = #tpu.dot_dimension_numbers<[1], [0], [0], [1], [0, 0, 1, 1], [], []>} : vector<8x128xf32>, vector<128x128xf32>, vector<8x128xf32> -> vector<8x128xf32>
    %32 = arith.addf %31, %9 : vector<8x128xf32>
    %33 = arith.negf %32 : vector<8x128xf32>
    %34 = math.exp %33 : vector<8x128xf32>
    %cst_16 = arith.constant 1.000000e+00 : f32
    %35 = vector.broadcast %cst_16 : f32 to vector<8x128xf32>
    %36 = arith.addf %35, %34 : vector<8x128xf32>
    %37 = arith.divf %35, %36 : vector<8x128xf32>
    %cst_17 = arith.constant dense<0.000000e+00> : vector<8x128xf32>
    %38 = tpu.matmul %37, %6, %cst_17 {dimension_numbers = #tpu.dot_dimension_numbers<[1], [0], [0], [1], [0, 0, 1, 1], [], []>} : vector<8x128xf32>, vector<128x128xf32>, vector<8x128xf32> -> vector<8x128xf32>
    %39 = arith.addf %38, %9 : vector<8x128xf32>
    %40 = arith.negf %39 : vector<8x128xf32>
    %41 = math.exp %40 : vector<8x128xf32>
    %cst_18 = arith.constant 1.000000e+00 : f32
    %42 = vector.broadcast %cst_18 : f32 to vector<8x128xf32>
    %43 = arith.addf %42, %41 : vector<8x128xf32>
    %44 = arith.divf %42, %43 : vector<8x128xf32>
    %cst_19 = arith.constant dense<0.000000e+00> : vector<8x128xf32>
    %45 = tpu.matmul %44, %6, %cst_19 {dimension_numbers = #tpu.dot_dimension_numbers<[1], [0], [0], [1], [0, 0, 1, 1], [], []>} : vector<8x128xf32>, vector<128x128xf32>, vector<8x128xf32> -> vector<8x128xf32>
    %46 = arith.addf %45, %9 : vector<8x128xf32>
    %47 = arith.negf %46 : vector<8x128xf32>
    %48 = math.exp %47 : vector<8x128xf32>
    %cst_20 = arith.constant 1.000000e+00 : f32
    %49 = vector.broadcast %cst_20 : f32 to vector<8x128xf32>
    %50 = arith.addf %49, %48 : vector<8x128xf32>
    %51 = arith.divf %49, %50 : vector<8x128xf32>
    %cst_21 = arith.constant dense<0.000000e+00> : vector<8x128xf32>
    %52 = tpu.matmul %51, %6, %cst_21 {dimension_numbers = #tpu.dot_dimension_numbers<[1], [0], [0], [1], [0, 0, 1, 1], [], []>} : vector<8x128xf32>, vector<128x128xf32>, vector<8x128xf32> -> vector<8x128xf32>
    %53 = arith.addf %52, %9 : vector<8x128xf32>
    %54 = arith.negf %53 : vector<8x128xf32>
    %55 = math.exp %54 : vector<8x128xf32>
    %cst_22 = arith.constant 1.000000e+00 : f32
    %56 = vector.broadcast %cst_22 : f32 to vector<8x128xf32>
    %57 = arith.addf %56, %55 : vector<8x128xf32>
    %58 = arith.divf %56, %57 : vector<8x128xf32>
    %cst_23 = arith.constant dense<0.000000e+00> : vector<8x128xf32>
    %59 = tpu.matmul %58, %6, %cst_23 {dimension_numbers = #tpu.dot_dimension_numbers<[1], [0], [0], [1], [0, 0, 1, 1], [], []>} : vector<8x128xf32>, vector<128x128xf32>, vector<8x128xf32> -> vector<8x128xf32>
    %60 = arith.addf %59, %9 : vector<8x128xf32>
    %61 = arith.negf %60 : vector<8x128xf32>
    %62 = math.exp %61 : vector<8x128xf32>
    %cst_24 = arith.constant 1.000000e+00 : f32
    %63 = vector.broadcast %cst_24 : f32 to vector<8x128xf32>
    %64 = arith.addf %63, %62 : vector<8x128xf32>
    %65 = arith.divf %63, %64 : vector<8x128xf32>
    %cst_25 = arith.constant dense<0.000000e+00> : vector<8x128xf32>
    %66 = tpu.matmul %65, %6, %cst_25 {dimension_numbers = #tpu.dot_dimension_numbers<[1], [0], [0], [1], [0, 0, 1, 1], [], []>} : vector<8x128xf32>, vector<128x128xf32>, vector<8x128xf32> -> vector<8x128xf32>
    %67 = arith.addf %66, %9 : vector<8x128xf32>
    %68 = arith.negf %67 : vector<8x128xf32>
    %69 = math.exp %68 : vector<8x128xf32>
    %cst_26 = arith.constant 1.000000e+00 : f32
    %70 = vector.broadcast %cst_26 : f32 to vector<8x128xf32>
    %71 = arith.addf %70, %69 : vector<8x128xf32>
    %72 = arith.divf %70, %71 : vector<8x128xf32>
    %cst_27 = arith.constant dense<0.000000e+00> : vector<8x128xf32>
    %73 = tpu.matmul %72, %6, %cst_27 {dimension_numbers = #tpu.dot_dimension_numbers<[1], [0], [0], [1], [0, 0, 1, 1], [], []>} : vector<8x128xf32>, vector<128x128xf32>, vector<8x128xf32> -> vector<8x128xf32>
    %74 = arith.addf %73, %9 : vector<8x128xf32>
    %75 = arith.negf %74 : vector<8x128xf32>
    %76 = math.exp %75 : vector<8x128xf32>
    %cst_28 = arith.constant 1.000000e+00 : f32
    %77 = vector.broadcast %cst_28 : f32 to vector<8x128xf32>
    %78 = arith.addf %77, %76 : vector<8x128xf32>
    %79 = arith.divf %77, %78 : vector<8x128xf32>
    %c0_29 = arith.constant 0 : index
    %c0_30 = arith.constant 0 : index
    %80 = vector.load %arg6[%c0_29, %c0_30] : memref<128x20xf32, #tpu.memory_space<vmem>>, vector<128x20xf32>
    %cst_31 = arith.constant dense<0.000000e+00> : vector<8x20xf32>
    %81 = tpu.matmul %79, %80, %cst_31 {dimension_numbers = #tpu.dot_dimension_numbers<[1], [0], [0], [1], [0, 0, 1, 1], [], []>} : vector<8x128xf32>, vector<128x20xf32>, vector<8x20xf32> -> vector<8x20xf32>
    %c0_32 = arith.constant 0 : index
    %c0_33 = arith.constant 0 : index
    %82 = vector.load %arg7[%c0_32, %c0_33] : memref<1x20xf32, #tpu.memory_space<vmem>>, vector<1x20xf32>
    %83 = vector.broadcast %82 : vector<1x20xf32> to vector<8x20xf32>
    %84 = arith.addf %81, %83 : vector<8x20xf32>
    %c0_34 = arith.constant 0 : index
    %c0_35 = arith.constant 0 : index
    %85 = vector.load %arg8[%c0_34, %c0_35] : memref<8x20xf32, #tpu.memory_space<vmem>>, vector<8x20xf32>
    tpu.vector_store %arg8[%c0_34, %c0_35], %84 {strides = array<i32>} : memref<8x20xf32, #tpu.memory_space<vmem>>, vector<8x20xf32>,
    return
  }
  func.func @transform_0(%arg0: i32) -> (i32, i32) {
    %c0_i32 = arith.constant 0 : i32
    %c0_i32_0 = arith.constant 0 : i32
    return %arg0, %c0_i32 : i32, i32
  }
  func.func @transform_1(%arg0: i32) -> (i32, i32) {
    %c0_i32 = arith.constant 0 : i32
    %c0_i32_0 = arith.constant 0 : i32
    %c0_i32_1 = arith.constant 0 : i32
    return %c0_i32, %c0_i32_0 : i32, i32
  }
  func.func @transform_2(%arg0: i32) -> (i32, i32) {
    %c0_i32 = arith.constant 0 : i32
    %c0_i32_0 = arith.constant 0 : i32
    %c0_i32_1 = arith.constant 0 : i32
    return %c0_i32, %c0_i32_0 : i32, i32
  }
  func.func @transform_3(%arg0: i32) -> (i32, i32) {
    %c0_i32 = arith.constant 0 : i32
    %c0_i32_0 = arith.constant 0 : i32
    %c0_i32_1 = arith.constant 0 : i32
    return %c0_i32, %c0_i32_0 : i32, i32
  }
  func.func @transform_4(%arg0: i32) -> (i32, i32) {
    %c0_i32 = arith.constant 0 : i32
    %c0_i32_0 = arith.constant 0 : i32
    %c0_i32_1 = arith.constant 0 : i32
    return %c0_i32, %c0_i32_0 : i32, i32
  }
  func.func @transform_5(%arg0: i32) -> (i32, i32) {
    %c0_i32 = arith.constant 0 : i32
    %c0_i32_0 = arith.constant 0 : i32
    %c0_i32_1 = arith.constant 0 : i32
    return %c0_i32, %c0_i32_0 : i32, i32
  }
  func.func @transform_6(%arg0: i32) -> (i32, i32) {
    %c0_i32 = arith.constant 0 : i32
    %c0_i32_0 = arith.constant 0 : i32
    %c0_i32_1 = arith.constant 0 : i32
    return %c0_i32, %c0_i32_0 : i32, i32
  }
  func.func @transform_7(%arg0: i32) -> (i32, i32) {
    %c0_i32 = arith.constant 0 : i32
    %c0_i32_0 = arith.constant 0 : i32
    return %arg0, %c0_i32 : i32, i32
  }
}

</mosaic_0001>

<bundles_post_ra>
// kernel: tpu_custom_call.1
= control target key start
LH: loop header
LB: loop body
LE: loop exit
PB: predicated region body
PF: predicated region fallthrough
CT: control target
= control target key end

     0   :  { %v1942_v2 = vmov 0.0|0.0   ;;  %vm1943_vm0 = vmmov 0   ;;  %v1944_v6 = vmov 0.0   ;;  %vm42_vm1 = vcmask 1043456   ;;  %s2339_s0 = inlined_call_operand.vmem [shape: f32[8,20], index: 0, kind: input, shape index: {}]   ;;  %s2340_s1 = inlined_call_operand.vmem [shape: f32[20,128], index: 1, kind: input, shape index: {}]   ;;  %s2341_s2 = inlined_call_operand.vmem [shape: f32[1,128], index: 2, kind: input, shape index: {}]   ;;  %s2342_s3 = inlined_call_operand.vmem [shape: f32[128,128], index: 3, kind: input, shape index: {}]   ;;  %s2343_s4 = inlined_call_operand.vmem [shape: f32[1,128], index: 4, kind: input, shape index: {}]   ;;  %s2344_s5 = inlined_call_operand.vmem [shape: f32[128,20], index: 5, kind: input, shape index: {}]   ;;  %s2345_s6 = inlined_call_operand.vmem [shape: f32[1,20], index: 6, kind: input, shape index: {}]   ;;  %s2346_s7 = inlined_call_operand.hbm [shape: f32[8,20], index: 7, kind: output, shape index: {}]  }
   0x1   :  { %v28_v0 = vld [vmem:[%s2340_s1] sm:$0xff]  ;;  %v29_v1 = vld [vmem:[%s2340_s1 + $0x8] sm:$0xff]  ;;  %1607 = vmatprep.subr.bf16.mxu0 %v1942_v2  ;;  %1610 = vmatprep.subr.bf16.mxu1 %v1942_v2  ;;  %v118_v8 = vld [vmem:[%s2342_s3 + $0x10] sm:$0xff]  ;;  %vm38_vm2 = vcmask 162816  }
   0x2   :  { %v1608_v3 = vpack.c.bf16 %v29_v1, %v28_v0  ;;  %v116_v4 = vld [vmem:[%s2342_s3] sm:$0xff]  ;;  %v117_v5 = vld [vmem:[%s2342_s3 + $0x8] sm:$0xff]  ;;  %1219 = vmatprep.mubr.msk.f32.mxu0 %vm1943_vm0, %v1944_v6  ;;  %v119_v9 = vld [vmem:[%s2342_s3 + $0x18] sm:$0xff]  ;;  %1254 = vmatprep.mubr.msk.f32.mxu1 %vm1943_vm0, %v1944_v6 }
   0x3   :  { %v2002_v7 = vpack.c.bf16 %v117_v5, %v116_v4  ;;  %v30_v10 = vld [vmem:[%s2340_s1 + $0x10] sm:$0xf]  ;;  %v2017_v11 = vpack.c.bf16 %v119_v9, %v118_v8  ;;  %v27_v12 = vld [vmem:[%s2339_s0] sm:$0xff]  ;;  %v121_v14 = vld [vmem:[%s2342_s3 + $0x28] sm:$0xff] }
   0x4   :  { %1609 = vmatpush3.bf16.msra.mxu0 %v1608_v3  ;;  %v120_v13 = vld [vmem:[%s2342_s3 + $0x20] sm:$0xff] }
   0x5   :  { %1217 = vmatprep.subr.mxu0 %v1944_v6  ;;  %1612 = vmatpush3.bf16.msra.mxu1 %v2002_v7 }
   0x6   :  { %1613 = vmatprep.subr.bf16.mxu1 %v1942_v2 }
   0x7   :  { %12 = vsyncpa [#allocation3], 0  ;;  %v2031_v15 = vpack.c.bf16 %v121_v14, %v120_v13  ;;  %v122_v16 = vld [vmem:[%s2342_s3 + $0x30] sm:$0xff]  ;;  %v123_v17 = vld [vmem:[%s2342_s3 + $0x38] sm:$0xff] }
   0x8   :  { %1218 = vmatpush3.msk.msra.mxu0 %vm42_vm1, %v30_v10  ;;  %v2046_v18 = vpack.c.bf16 %v123_v17, %v122_v16  ;;  %v124_v19 = vld [vmem:[%s2342_s3 + $0x40] sm:$0xff]  ;;  %v125_v20 = vld [vmem:[%s2342_s3 + $0x48] sm:$0xff]  ;;  %v126_v22 = vld [vmem:[%s2342_s3 + $0x50] sm:$0xff] }
   0x9   :  { %1220 = vmatmul.mubr.msk.f32.vlgmr.msra.gmra.mrb[0].mxu0 %vm38_vm2, %v27_v12  ;;  %1615 = vmatpush3.bf16.msra.mxu1 %v2017_v11  ;;  %v2058_v21 = vpack.c.bf16 %v125_v20, %v124_v19  ;;  %v127_v23 = vld [vmem:[%s2342_s3 + $0x58] sm:$0xff]  ;;  %v128_v25 = vld [vmem:[%s2342_s3 + $0x60] sm:$0xff]  ;;  %v129_v26 = vld [vmem:[%s2342_s3 + $0x68] sm:$0xff] }
   0xa   :  { %1616 = vmatprep.subr.bf16.mxu1 %v1942_v2  ;;  %1634 = vmatprep.subr.bf16.mxu0 %v1942_v2  ;;  %v2070_v24 = vpack.c.bf16 %v127_v23, %v126_v22  ;;  %v2082_v27 = vpack.c.bf16 %v129_v26, %v128_v25  ;;  %v130_v28 = vld [vmem:[%s2342_s3 + $0x70] sm:$0xff]  ;;  %v131_v29 = vld [vmem:[%s2342_s3 + $0x78] sm:$0xff]  ;;  %v1007_v31 = vld [vmem:[%s2341_s2] ss:$0 sm:$0xff] }
   0xb   :  { %1636 = vmatpush3.bf16.msra.mxu0 %v2002_v7  ;;  %1289 = vmatprep.mubr.msk.f32.mxu0 %vm1943_vm0, %v1944_v6  ;;  %v2099_v30 = vpack.c.bf16 %v131_v29, %v130_v28  ;;  %v2129_v35 = vld [vmem:[%s2343_s4] ss:$0 sm:$0xff] }
   0xc   :  { %1637 = vmatprep.subr.bf16.mxu0 %v1942_v2 }
   0xd   :  { %1618 = vmatpush3.bf16.msra.mxu1 %v2031_v15 }
   0xe   :  { %1619 = vmatprep.subr.bf16.mxu1 %v1942_v2 }
   0xf   :  { %1639 = vmatpush3.bf16.msra.mxu0 %v2017_v11 }
  0x10   :  { %1640 = vmatprep.subr.bf16.mxu0 %v1942_v2 }
  0x11   :  { %1621 = vmatpush3.bf16.msra.mxu1 %v2046_v18 }
  0x12   :  { %1622 = vmatprep.subr.bf16.mxu1 %v1942_v2 }
  0x13   :  { %1642 = vmatpush3.bf16.msra.mxu0 %v2031_v15 }
  0x14   :  { %1643 = vmatprep.subr.bf16.mxu0 %v1942_v2 }
  0x15   :  { %1624 = vmatpush3.bf16.msra.mxu1 %v2058_v21 }
  0x16   :  { %1625 = vmatprep.subr.bf16.mxu1 %v1942_v2 }
  0x17   :  { %1645 = vmatpush3.bf16.msra.mxu0 %v2046_v18 }
  0x18   :  { %1646 = vmatprep.subr.bf16.mxu0 %v1942_v2 }
  0x19   :  { %1627 = vmatpush3.bf16.msra.mxu1 %v2070_v24 }
  0x1a   :  { %1628 = vmatprep.subr.bf16.mxu1 %v1942_v2 }
  0x1b   :  { %1648 = vmatpush3.bf16.msra.mxu0 %v2058_v21 }
  0x1c   :  { %1649 = vmatprep.subr.bf16.mxu0 %v1942_v2 }
  0x1d   :  { %1630 = vmatpush3.bf16.msra.mxu1 %v2082_v27 }
  0x1e   :  { %1631 = vmatprep.subr.bf16.mxu1 %v1942_v2 }
  0x1f   :  { %1651 = vmatpush3.bf16.msra.mxu0 %v2070_v24 }
  0x20   :  { %1652 = vmatprep.subr.bf16.mxu0 %v1942_v2 }
  0x21   :  { %1633 = vmatpush3.bf16.msra.mxu1 %v2099_v30 }
  0x22   :  { %1658 = vmatprep.subr.bf16.mxu1 %v1942_v2 }
  0x23   :  { %1654 = vmatpush3.bf16.msra.mxu0 %v2082_v27 }
  0x24   :  { %1655 = vmatprep.subr.bf16.mxu0 %v1942_v2 }
  0x27   :  { %1657 = vmatpush3.bf16.msra.mxu0 %v2099_v30 }
  0x28   :  { %1682 = vmatprep.subr.bf16.mxu0 %v1942_v2 }
  0xdc   :  { %v112_v32 = vpop.f32.mrb[0].mxu0 }
  0xdd   :  { %v113_v33 = vadd.f32 %v1007_v31, %v112_v32  ;;  %v1221_v34 = vpop.f32.mrb[1].mxu0 }
  0xdf   :  { %1255 = vmatmul.mubr.f32.vlgmr.msra.gmra.mrb[0].mxu1 %v113_v33 }
  0xe0   :  { %1660 = vmatpush3.bf16.msra.mxu1 %v2002_v7  ;;  %1324 = vmatprep.mubr.msk.f32.mxu1 %vm1943_vm0, %v1944_v6 }
  0xe1   :  { %1661 = vmatprep.subr.bf16.mxu1 %v1942_v2 }
  0xe4   :  { %1663 = vmatpush3.bf16.msra.mxu1 %v2017_v11 }
  0xe5   :  { %1664 = vmatprep.subr.bf16.mxu1 %v1942_v2 }
  0xe8   :  { %1666 = vmatpush3.bf16.msra.mxu1 %v2031_v15 }
  0xe9   :  { %1667 = vmatprep.subr.bf16.mxu1 %v1942_v2 }
  0xec   :  { %1669 = vmatpush3.bf16.msra.mxu1 %v2046_v18 }
  0xed   :  { %1670 = vmatprep.subr.bf16.mxu1 %v1942_v2 }
  0xf0   :  { %1672 = vmatpush3.bf16.msra.mxu1 %v2058_v21 }
  0xf1   :  { %1673 = vmatprep.subr.bf16.mxu1 %v1942_v2 }
  0xf4   :  { %1675 = vmatpush3.bf16.msra.mxu1 %v2070_v24 }
  0xf5   :  { %1676 = vmatprep.subr.bf16.mxu1 %v1942_v2 }
  0xf8   :  { %1678 = vmatpush3.bf16.msra.mxu1 %v2082_v27 }
  0xf9   :  { %1679 = vmatprep.subr.bf16.mxu1 %v1942_v2 }
  0xfc   :  { %1681 = vmatpush3.bf16.msra.mxu1 %v2099_v30 }
  0xfd   :  { %1706 = vmatprep.subr.bf16.mxu1 %v1942_v2 }
 0x1b2   :  { %v205_v36 = vpop.f32.mrb[0].mxu1 }
 0x1b3   :  { %v206_v37 = vadd.f32 %v2129_v35, %v205_v36  ;;  %v1256_v38 = vpop.f32.mrb[1].mxu1 }
 0x1b5   :  { %v1011_v39 = vmul.f32 -1.442695, %v206_v37 }
 0x1b7   :  { %1878 = vpow2.f32 %v1011_v39 }
 0x1c1   :  { %v1879_v40 = vpop.eup %1878 }
 0x1c2   :  { %v212_v41 = vadd.f32 1.0, %v1879_v40  ;;  %v901_v40 = vld [vmem:[%s2344_s5 + $0x10] sm:$0xff] }
 0x1c4   :  { %1880 = vrcp.f32 %v212_v41  ;;  %v902_v41 = vld [vmem:[%s2344_s5 + $0x18] sm:$0xff] }
 0x1ce   :  { %v1881_v42 = vpop.eup %1880 }
 0x1cf   :  { %1290 = vmatmul.mubr.f32.vlgmr.msra.gmra.mrb[2].mxu0 %v1881_v42  ;;  %v1854_v42 = vpack.c.bf16 %v902_v41, %v901_v40 }
 0x1d0   :  { %1684 = vmatpush3.bf16.msra.mxu0 %v2002_v7  ;;  %1359 = vmatprep.mubr.msk.f32.mxu0 %vm1943_vm0, %v1944_v6 }
 0x1d1   :  { %1685 = vmatprep.subr.bf16.mxu0 %v1942_v2 }
 0x1d4   :  { %1687 = vmatpush3.bf16.msra.mxu0 %v2017_v11 }
 0x1d5   :  { %1688 = vmatprep.subr.bf16.mxu0 %v1942_v2 }
 0x1d8   :  { %1690 = vmatpush3.bf16.msra.mxu0 %v2031_v15 }
 0x1d9   :  { %1691 = vmatprep.subr.bf16.mxu0 %v1942_v2 }
 0x1dc   :  { %1693 = vmatpush3.bf16.msra.mxu0 %v2046_v18 }
 0x1dd   :  { %1694 = vmatprep.subr.bf16.mxu0 %v1942_v2 }
 0x1e0   :  { %1696 = vmatpush3.bf16.msra.mxu0 %v2058_v21 }
 0x1e1   :  { %1697 = vmatprep.subr.bf16.mxu0 %v1942_v2 }
 0x1e4   :  { %1699 = vmatpush3.bf16.msra.mxu0 %v2070_v24 }
 0x1e5   :  { %1700 = vmatprep.subr.bf16.mxu0 %v1942_v2 }
 0x1e8   :  { %1702 = vmatpush3.bf16.msra.mxu0 %v2082_v27 }
 0x1e9   :  { %1703 = vmatprep.subr.bf16.mxu0 %v1942_v2 }
 0x1ec   :  { %1705 = vmatpush3.bf16.msra.mxu0 %v2099_v30 }
 0x1ed   :  { %1730 = vmatprep.subr.bf16.mxu0 %v1942_v2 }
 0x2a2   :  { %v281_v43 = vpop.f32.mrb[2].mxu0 }
 0x2a3   :  { %v282_v44 = vadd.f32 %v2129_v35, %v281_v43  ;;  %v1291_v45 = vpop.f32.mrb[3].mxu0  ;;  %v903_v43 = vld [vmem:[%s2344_s5 + $0x20] sm:$0xff] }
 0x2a5   :  { %v1012_v46 = vmul.f32 -1.442695, %v282_v44  ;;  %v904_v44 = vld [vmem:[%s2344_s5 + $0x28] sm:$0xff] }
 0x2a6   :  { %v1857_v45 = vpack.c.bf16 %v904_v44, %v903_v43 }
 0x2a7   :  { %1882 = vpow2.f32 %v1012_v46  ;;  %v905_v46 = vld [vmem:[%s2344_s5 + $0x30] sm:$0xff] }
 0x2b1   :  { %v1883_v47 = vpop.eup %1882 }
 0x2b2   :  { %v288_v48 = vadd.f32 1.0, %v1883_v47  ;;  %v906_v47 = vld [vmem:[%s2344_s5 + $0x38] sm:$0xff] }
 0x2b4   :  { %1884 = vrcp.f32 %v288_v48  ;;  %v1860_v48 = vpack.c.bf16 %v906_v47, %v905_v46 }
 0x2be   :  { %v1885_v49 = vpop.eup %1884 }
 0x2bf   :  { %1325 = vmatmul.mubr.f32.vlgmr.msra.gmra.mrb[2].mxu1 %v1885_v49  ;;  %v907_v49 = vld [vmem:[%s2344_s5 + $0x40] sm:$0xff] }
 0x2c0   :  { %1708 = vmatpush3.bf16.msra.mxu1 %v2002_v7  ;;  %1394 = vmatprep.mubr.msk.f32.mxu1 %vm1943_vm0, %v1944_v6 }
 0x2c1   :  { %1709 = vmatprep.subr.bf16.mxu1 %v1942_v2 }
 0x2c4   :  { %1711 = vmatpush3.bf16.msra.mxu1 %v2017_v11 }
 0x2c5   :  { %1712 = vmatprep.subr.bf16.mxu1 %v1942_v2 }
 0x2c8   :  { %1714 = vmatpush3.bf16.msra.mxu1 %v2031_v15 }
 0x2c9   :  { %1715 = vmatprep.subr.bf16.mxu1 %v1942_v2 }
 0x2cc   :  { %1717 = vmatpush3.bf16.msra.mxu1 %v2046_v18 }
 0x2cd   :  { %1718 = vmatprep.subr.bf16.mxu1 %v1942_v2 }
 0x2d0   :  { %1720 = vmatpush3.bf16.msra.mxu1 %v2058_v21 }
 0x2d1   :  { %1721 = vmatprep.subr.bf16.mxu1 %v1942_v2 }
 0x2d4   :  { %1723 = vmatpush3.bf16.msra.mxu1 %v2070_v24 }
 0x2d5   :  { %1724 = vmatprep.subr.bf16.mxu1 %v1942_v2 }
 0x2d8   :  { %1726 = vmatpush3.bf16.msra.mxu1 %v2082_v27 }
 0x2d9   :  { %1727 = vmatprep.subr.bf16.mxu1 %v1942_v2 }
 0x2dc   :  { %1729 = vmatpush3.bf16.msra.mxu1 %v2099_v30 }
 0x2dd   :  { %1754 = vmatprep.subr.bf16.mxu1 %v1942_v2 }
 0x392   :  { %v357_v50 = vpop.f32.mrb[2].mxu1 }
 0x393   :  { %v358_v51 = vadd.f32 %v2129_v35, %v357_v50  ;;  %v1326_v52 = vpop.f32.mrb[3].mxu1  ;;  %v908_v50 = vld [vmem:[%s2344_s5 + $0x48] sm:$0xff] }
 0x394   :  { %v909_v52 = vld [vmem:[%s2344_s5 + $0x50] sm:$0xff] }
 0x395   :  { %v1013_v53 = vmul.f32 -1.442695, %v358_v51  ;;  %v1863_v51 = vpack.c.bf16 %v908_v50, %v907_v49 }
 0x397   :  { %1886 = vpow2.f32 %v1013_v53  ;;  %v910_v53 = vld [vmem:[%s2344_s5 + $0x58] sm:$0xff] }
 0x3a1   :  { %v1887_v54 = vpop.eup %1886 }
 0x3a2   :  { %v364_v55 = vadd.f32 1.0, %v1887_v54  ;;  %v1866_v54 = vpack.c.bf16 %v910_v53, %v909_v52 }
 0x3a4   :  { %1888 = vrcp.f32 %v364_v55  ;;  %v911_v55 = vld [vmem:[%s2344_s5 + $0x60] sm:$0xff] }
 0x3ae   :  { %v1889_v56 = vpop.eup %1888 }
 0x3af   :  { %1360 = vmatmul.mubr.f32.vlgmr.msra.gmra.mrb[4].mxu0 %v1889_v56  ;;  %v912_v56 = vld [vmem:[%s2344_s5 + $0x68] sm:$0xff] }
 0x3b0   :  { %1732 = vmatpush3.bf16.msra.mxu0 %v2002_v7  ;;  %1429 = vmatprep.mubr.msk.f32.mxu0 %vm1943_vm0, %v1944_v6 }
 0x3b1   :  { %1733 = vmatprep.subr.bf16.mxu0 %v1942_v2 }
 0x3b4   :  { %1735 = vmatpush3.bf16.msra.mxu0 %v2017_v11 }
 0x3b5   :  { %1736 = vmatprep.subr.bf16.mxu0 %v1942_v2 }
 0x3b8   :  { %1738 = vmatpush3.bf16.msra.mxu0 %v2031_v15 }
 0x3b9   :  { %1739 = vmatprep.subr.bf16.mxu0 %v1942_v2 }
 0x3bc   :  { %1741 = vmatpush3.bf16.msra.mxu0 %v2046_v18 }
 0x3bd   :  { %1742 = vmatprep.subr.bf16.mxu0 %v1942_v2 }
 0x3c0   :  { %1744 = vmatpush3.bf16.msra.mxu0 %v2058_v21 }
 0x3c1   :  { %1745 = vmatprep.subr.bf16.mxu0 %v1942_v2 }
 0x3c4   :  { %1747 = vmatpush3.bf16.msra.mxu0 %v2070_v24 }
 0x3c5   :  { %1748 = vmatprep.subr.bf16.mxu0 %v1942_v2 }
 0x3c8   :  { %1750 = vmatpush3.bf16.msra.mxu0 %v2082_v27 }
 0x3c9   :  { %1751 = vmatprep.subr.bf16.mxu0 %v1942_v2 }
 0x3cc   :  { %1753 = vmatpush3.bf16.msra.mxu0 %v2099_v30 }
 0x3cd   :  { %1778 = vmatprep.subr.bf16.mxu0 %v1942_v2 }
 0x482   :  { %v433_v57 = vpop.f32.mrb[4].mxu0 }
 0x483   :  { %v434_v58 = vadd.f32 %v2129_v35, %v433_v57  ;;  %v1361_v59 = vpop.f32.mrb[5].mxu0  ;;  %v1869_v57 = vpack.c.bf16 %v912_v56, %v911_v55 }
 0x484   :  { %v914_v59 = vld [vmem:[%s2344_s5 + $0x78] sm:$0xff] }
 0x485   :  { %v1014_v60 = vmul.f32 -1.442695, %v434_v58  ;;  %v913_v58 = vld [vmem:[%s2344_s5 + $0x70] sm:$0xff] }
 0x487   :  { %1890 = vpow2.f32 %v1014_v60  ;;  %v1872_v60 = vpack.c.bf16 %v914_v59, %v913_v58 }
 0x491   :  { %v1891_v61 = vpop.eup %1890 }
 0x492   :  { %v440_v62 = vadd.f32 1.0, %v1891_v61 }
 0x494   :  { %1892 = vrcp.f32 %v440_v62 }
 0x49e   :  { %v1893_v63 = vpop.eup %1892 }
 0x49f   :  { %1395 = vmatmul.mubr.f32.vlgmr.msra.gmra.mrb[4].mxu1 %v1893_v63 }
 0x4a0   :  { %1756 = vmatpush3.bf16.msra.mxu1 %v2002_v7  ;;  %1464 = vmatprep.mubr.msk.f32.mxu1 %vm1943_vm0, %v1944_v6 }
 0x4a1   :  { %1757 = vmatprep.subr.bf16.mxu1 %v1942_v2 }
 0x4a4   :  { %1759 = vmatpush3.bf16.msra.mxu1 %v2017_v11 }
 0x4a5   :  { %1760 = vmatprep.subr.bf16.mxu1 %v1942_v2 }
 0x4a8   :  { %1762 = vmatpush3.bf16.msra.mxu1 %v2031_v15 }
 0x4a9   :  { %1763 = vmatprep.subr.bf16.mxu1 %v1942_v2 }
 0x4ac   :  { %1765 = vmatpush3.bf16.msra.mxu1 %v2046_v18 }
 0x4ad   :  { %1766 = vmatprep.subr.bf16.mxu1 %v1942_v2 }
 0x4b0   :  { %1768 = vmatpush3.bf16.msra.mxu1 %v2058_v21 }
 0x4b1   :  { %1769 = vmatprep.subr.bf16.mxu1 %v1942_v2 }
 0x4b4   :  { %1771 = vmatpush3.bf16.msra.mxu1 %v2070_v24 }
 0x4b5   :  { %1772 = vmatprep.subr.bf16.mxu1 %v1942_v2 }
 0x4b8   :  { %1774 = vmatpush3.bf16.msra.mxu1 %v2082_v27 }
 0x4b9   :  { %1775 = vmatprep.subr.bf16.mxu1 %v1942_v2 }
 0x4bc   :  { %1777 = vmatpush3.bf16.msra.mxu1 %v2099_v30 }
 0x4bd   :  { %1802 = vmatprep.subr.bf16.mxu1 %v1942_v2 }
 0x572   :  { %v509_v0 = vpop.f32.mrb[4].mxu1 }
 0x573   :  { %v510_v1 = vadd.f32 %v2129_v35, %v509_v0  ;;  %v1396_v3 = vpop.f32.mrb[5].mxu1 }
 0x575   :  { %v1015_v4 = vmul.f32 -1.442695, %v510_v1 }
 0x577   :  { %1894 = vpow2.f32 %v1015_v4 }
 0x581   :  { %v1895_v5 = vpop.eup %1894 }
 0x582   :  { %v516_v8 = vadd.f32 1.0, %v1895_v5  ;;  %v1021_v5 = vld [vmem:[%s2345_s6] ss:$0 sm:$0xff] }
 0x584   :  { %1896 = vrcp.f32 %v516_v8 }
 0x58e   :  { %v1897_v9 = vpop.eup %1896 }
 0x58f   :  { %1430 = vmatmul.mubr.f32.vlgmr.msra.gmra.mrb[6].mxu0 %v1897_v9 }
 0x590   :  { %1780 = vmatpush3.bf16.msra.mxu0 %v2002_v7  ;;  %1499 = vmatprep.mubr.msk.f32.mxu0 %vm1943_vm0, %v1944_v6 }
 0x591   :  { %1781 = vmatprep.subr.bf16.mxu0 %v1942_v2 }
 0x594   :  { %1783 = vmatpush3.bf16.msra.mxu0 %v2017_v11 }
 0x595   :  { %1784 = vmatprep.subr.bf16.mxu0 %v1942_v2 }
 0x598   :  { %1786 = vmatpush3.bf16.msra.mxu0 %v2031_v15 }
 0x599   :  { %1787 = vmatprep.subr.bf16.mxu0 %v1942_v2 }
 0x59c   :  { %1789 = vmatpush3.bf16.msra.mxu0 %v2046_v18 }
 0x59d   :  { %1790 = vmatprep.subr.bf16.mxu0 %v1942_v2 }
 0x5a0   :  { %1792 = vmatpush3.bf16.msra.mxu0 %v2058_v21 }
 0x5a1   :  { %1793 = vmatprep.subr.bf16.mxu0 %v1942_v2 }
 0x5a4   :  { %1795 = vmatpush3.bf16.msra.mxu0 %v2070_v24 }
 0x5a5   :  { %1796 = vmatprep.subr.bf16.mxu0 %v1942_v2 }
 0x5a8   :  { %1798 = vmatpush3.bf16.msra.mxu0 %v2082_v27 }
 0x5a9   :  { %1799 = vmatprep.subr.bf16.mxu0 %v1942_v2 }
 0x5ac   :  { %1801 = vmatpush3.bf16.msra.mxu0 %v2099_v30 }
 0x5ad   :  { %1826 = vmatprep.subr.bf16.mxu0 %v1942_v2 }
 0x662   :  { %v585_v10 = vpop.f32.mrb[6].mxu0 }
 0x663   :  { %v586_v12 = vadd.f32 %v2129_v35, %v585_v10  ;;  %v1431_v13 = vpop.f32.mrb[7].mxu0 }
 0x665   :  { %v1016_v14 = vmul.f32 -1.442695, %v586_v12 }
 0x667   :  { %1898 = vpow2.f32 %v1016_v14 }
 0x671   :  { %v1899_v16 = vpop.eup %1898 }
 0x672   :  { %v592_v17 = vadd.f32 1.0, %v1899_v16 }
 0x674   :  { %1900 = vrcp.f32 %v592_v17 }
 0x67e   :  { %v1901_v19 = vpop.eup %1900 }
 0x67f   :  { %1465 = vmatmul.mubr.f32.vlgmr.msra.gmra.mrb[6].mxu1 %v1901_v19 }
 0x680   :  { %1804 = vmatpush3.bf16.msra.mxu1 %v2002_v7  ;;  %1534 = vmatprep.mubr.msk.f32.mxu1 %vm1943_vm0, %v1944_v6 }
 0x681   :  { %1805 = vmatprep.subr.bf16.mxu1 %v1942_v2 }
 0x684   :  { %1807 = vmatpush3.bf16.msra.mxu1 %v2017_v11 }
 0x685   :  { %1808 = vmatprep.subr.bf16.mxu1 %v1942_v2 }
 0x688   :  { %1810 = vmatpush3.bf16.msra.mxu1 %v2031_v15 }
 0x689   :  { %1811 = vmatprep.subr.bf16.mxu1 %v1942_v2 }
 0x68c   :  { %1813 = vmatpush3.bf16.msra.mxu1 %v2046_v18 }
 0x68d   :  { %1814 = vmatprep.subr.bf16.mxu1 %v1942_v2 }
 0x690   :  { %1816 = vmatpush3.bf16.msra.mxu1 %v2058_v21 }
 0x691   :  { %1817 = vmatprep.subr.bf16.mxu1 %v1942_v2 }
 0x694   :  { %1819 = vmatpush3.bf16.msra.mxu1 %v2070_v24 }
 0x695   :  { %1820 = vmatprep.subr.bf16.mxu1 %v1942_v2 }
 0x698   :  { %1822 = vmatpush3.bf16.msra.mxu1 %v2082_v27 }
 0x699   :  { %1823 = vmatprep.subr.bf16.mxu1 %v1942_v2 }
 0x69c   :  { %1825 = vmatpush3.bf16.msra.mxu1 %v2099_v30 }
 0x69d   :  { %1850 = vmatprep.subr.bf16.mxu1 %v1942_v2 }
 0x752   :  { %v661_v20 = vpop.f32.mrb[6].mxu1 }
 0x753   :  { %v662_v22 = vadd.f32 %v2129_v35, %v661_v20  ;;  %v1466_v23 = vpop.f32.mrb[7].mxu1 }
 0x755   :  { %v1017_v25 = vmul.f32 -1.442695, %v662_v22 }
 0x757   :  { %1902 = vpow2.f32 %v1017_v25 }
 0x761   :  { %v1903_v26 = vpop.eup %1902 }
 0x762   :  { %v668_v28 = vadd.f32 1.0, %v1903_v26 }
 0x764   :  { %1904 = vrcp.f32 %v668_v28 }
 0x76e   :  { %v1905_v29 = vpop.eup %1904 }
 0x76f   :  { %1500 = vmatmul.mubr.f32.vlgmr.msra.gmra.mrb[8].mxu0 %v1905_v29 }
 0x770   :  { %1828 = vmatpush3.bf16.msra.mxu0 %v2002_v7  ;;  %1569 = vmatprep.mubr.msk.f32.mxu0 %vm1943_vm0, %v1944_v6 }
 0x771   :  { %1829 = vmatprep.subr.bf16.mxu0 %v1942_v2 }
 0x774   :  { %1831 = vmatpush3.bf16.msra.mxu0 %v2017_v11 }
 0x775   :  { %1832 = vmatprep.subr.bf16.mxu0 %v1942_v2 }
 0x778   :  { %1834 = vmatpush3.bf16.msra.mxu0 %v2031_v15 }
 0x779   :  { %1835 = vmatprep.subr.bf16.mxu0 %v1942_v2 }
 0x77c   :  { %1837 = vmatpush3.bf16.msra.mxu0 %v2046_v18 }
 0x77d   :  { %1838 = vmatprep.subr.bf16.mxu0 %v1942_v2 }
 0x780   :  { %1840 = vmatpush3.bf16.msra.mxu0 %v2058_v21 }
 0x781   :  { %1841 = vmatprep.subr.bf16.mxu0 %v1942_v2 }
 0x784   :  { %1843 = vmatpush3.bf16.msra.mxu0 %v2070_v24  ;;  %v899_v24 = vld [vmem:[%s2344_s5] sm:$0xff] }
 0x785   :  { %1844 = vmatprep.subr.bf16.mxu0 %v1942_v2 }
 0x788   :  { %1846 = vmatpush3.bf16.msra.mxu0 %v2082_v27  ;;  %v900_v27 = vld [vmem:[%s2344_s5 + $0x8] sm:$0xff]  ;;  %s1945_s5 = smov [#allocation2]  }
 0x789   :  { %1847 = vmatprep.subr.bf16.mxu0 %v1942_v2  ;;  %s999_s21 = sshll.u32 %s1945_s5, 4  ;;  %s1000_s21 = int_to_ptr.vmem [resolvable:$true] %s999_s21 }
 0x78a   :  { %s1918_s22 = scalar_lea.vmem %s1000_s21, 128  ;;  %p1923_p1 = scmp.lt.s32.totalorder %s1000_s21, %s1000_s21 }
 0x78b   :  { %p1919_p0 = scmp.ne.s32.totalorder %s1000_s21, %s1918_s22  ;;  %p1924_p2 = scmp.lt.s32.totalorder %s1918_s22, %s1918_s22 }
 0x78c   :  { %1849 = vmatpush3.bf16.msra.mxu0 %v2099_v30  ;;  %v1851_v30 = vpack.c.bf16 %v900_v27, %v899_v24 }
 0x78d   :  { %p1925_p3 = por %p1924_p2, %p1923_p1 }
 0x78f   :  { %p1926_p4 = pnand %p1925_p3, %p1919_p0 }
 0x842   :  { %v737_v7 = vpop.f32.mrb[8].mxu0 }
 0x843   :  { %v738_v11 = vadd.f32 %v2129_v35, %v737_v7  ;;  %v1501_v15 = vpop.f32.mrb[9].mxu0 }
 0x845   :  { %v1018_v18 = vmul.f32 -1.442695, %v738_v11 }
 0x847   :  { %1906 = vpow2.f32 %v1018_v18 }
 0x851   :  { %v1907_v31 = vpop.eup %1906 }
 0x852   :  { %v744_v21 = vadd.f32 1.0, %v1907_v31 }
 0x854   :  { %1908 = vrcp.f32 %v744_v21 }
 0x85e   :  { %v1909_v32 = vpop.eup %1908 }
 0x85f   :  { %1535 = vmatmul.mubr.f32.vlgmr.msra.gmra.mrb[8].mxu1 %v1909_v32 }
 0x860   :  { %1604 = vmatprep.mubr.msk.f32.mxu1 %vm1943_vm0, %v1944_v6  ;;  %1852 = vmatpush3.bf16.msra.mxu1 %v1851_v30 }
 0x861   :  { %1853 = vmatprep.subr.bf16.mxu1 %v1942_v2 }
 0x864   :  { %1855 = vmatpush3.bf16.msra.mxu1 %v1854_v42 }
 0x865   :  { %1856 = vmatprep.subr.bf16.mxu1 %v1942_v2 }
 0x868   :  { %1858 = vmatpush3.bf16.msra.mxu1 %v1857_v45 }
 0x869   :  { %1859 = vmatprep.subr.bf16.mxu1 %v1942_v2 }
 0x86c   :  { %1861 = vmatpush3.bf16.msra.mxu1 %v1860_v48 }
 0x86d   :  { %1862 = vmatprep.subr.bf16.mxu1 %v1942_v2 }
 0x870   :  { %1864 = vmatpush3.bf16.msra.mxu1 %v1863_v51 }
 0x871   :  { %1865 = vmatprep.subr.bf16.mxu1 %v1942_v2 }
 0x874   :  { %1867 = vmatpush3.bf16.msra.mxu1 %v1866_v54 }
 0x875   :  { %1868 = vmatprep.subr.bf16.mxu1 %v1942_v2 }
 0x878   :  { %1870 = vmatpush3.bf16.msra.mxu1 %v1869_v57 }
 0x879   :  { %1871 = vmatprep.subr.bf16.mxu1 %v1942_v2 }
 0x87c   :  { %1873 = vmatpush3.bf16.msra.mxu1 %v1872_v60 }
 0x932   :  { %v813_v33 = vpop.f32.mrb[8].mxu1 }
 0x933   :  { %v814_v34 = vadd.f32 %v2129_v35, %v813_v33  ;;  %v1536_v36 = vpop.f32.mrb[9].mxu1 }
 0x935   :  { %v1019_v37 = vmul.f32 -1.442695, %v814_v34 }
 0x937   :  { %1910 = vpow2.f32 %v1019_v37 }
 0x941   :  { %v1911_v38 = vpop.eup %1910 }
 0x942   :  { %v820_v6 = vadd.f32 1.0, %v1911_v38 }
 0x944   :  { %1912 = vrcp.f32 %v820_v6 }
 0x94e   :  { %v1913_v39 = vpop.eup %1912 }
 0x94f   :  { %1570 = vmatmul.mubr.f32.vlgmr.msra.gmra.mrb[10].mxu0 %v1913_v39 }
 0xa22   :  { %v889_v61 = vpop.f32.mrb[10].mxu0 }
 0xa23   :  { %v890_v62 = vadd.f32 %v2129_v35, %v889_v61  ;;  %v1571_v63 = vpop.f32.mrb[11].mxu0 }
 0xa25   :  { %v1020_v0 = vmul.f32 -1.442695, %v890_v62 }
 0xa27   :  { %1914 = vpow2.f32 %v1020_v0 }
 0xa31   :  { %v1915_v1 = vpop.eup %1914 }
 0xa32   :  { %v896_v3 = vadd.f32 1.0, %v1915_v1 }
 0xa34   :  { %1916 = vrcp.f32 %v896_v3 }
 0xa3e   :  { %v1917_v4 = vpop.eup %1916 }
 0xa3f   :  { %1605 = vmatmul.mubr.f32.vlgmr.msra.gmra.mrb[10].mxu1 %v1917_v4 }
 0xb12   :  { %v988_v8 = vpop.f32.mrb[10].mxu1 }
 0xb13   :  { %v989_v2 = vadd.f32 %v1021_v5, %v988_v8  ;;  %v1606_v9 = vpop.f32.mrb[11].mxu1 }
 0xb15   :  { %992 = vst.msk [vmem:[#allocation2] sm:$0xff] %vm38_vm2, %v989_v2 }
 0xb16   :  { %1929 = shalt.err (!%p1926_p4)
}
 0xb17   :  { %s1930_s25 = scalar_lea.hbm %s2346_s7, 128 }
 0xb18   :  { %p1931_p5 = scmp.ne.s32.totalorder %s2346_s7, %s1930_s25  ;;  %p1934_p6 = scmp.lt.u32.totalorder %s1930_s25, %s2346_s7 }
 0xb1a   :  { %p1936_p7 = pnand %p1934_p6, %p1931_p5 }
 0xb1c   :  { %1939 = shalt.err (!%p1936_p7)
}
 0xb1d   :  { %1002 = dma.vmem_to_hbm [thread:$0]  %s1000_s21, 128, %s2346_s7, [#allocation3]  }
 0xb1e   :  { %1940 = dma.done.wait [#allocation3], 128  }
 0xb1f   :  { %1941 = vsyncadd [#allocation3], 4294967168 }
 0xb20   :  { %1006 = vsyncpa [#allocation3], 1 }

</bundles_post_ra>
